<compile_context>
chip_gen: v5e
topology: v5e:2x2
jax: 0.10.0
libtpu: 0.0.40
codegen_flags: <defaults>
</compile_context>

<pallas_src>
import functools

import numpy as np

import jax
import jax.numpy as jnp
from jax import lax
from jax.experimental import pallas as pl
from jax.experimental.pallas import tpu as pltpu


def _build_banded_weight(w_hwio, W, k_pad, dtype):
    """Fold the 3 kx taps and the width zero-padding of a 3x3 conv into banded matrices.

    w_hwio : [3, 3, Cin, Cout] (HWIO cross-correlation taps)
    returns: [3, k_pad, W*Cout] with
        M[ky, cc*Cin + i, c*Cout + o] = w[ky, kx, i, o]  for cc = c + kx - 1 in [0, W)
    (rows >= W*Cin are zero K-padding), so that  sum_ky rows_shifted(ky) @ M[ky]
    reproduces a 'same'-padded 3x3 conv over the fused (W, C) lane axis.
    """
    kH, kW, cin, cout = w_hwio.shape
    w = np.asarray(w_hwio, dtype=np.float32)
    M = np.zeros((kH, k_pad, W * cout), dtype=np.float32)
    for ky in range(kH):
        for kx in range(kW):
            for c in range(W):
                cc = c + (kx - 1)
                if 0 <= cc < W:
                    M[ky, cc * cin:(cc + 1) * cin, c * cout:(c + 1) * cout] = w[ky, kx]
    return jnp.asarray(M, dtype=dtype)


def _res_conv_stack_kernel(*refs, res_num, B_blk, H, P, g, widths, wout, op_dtype):
    # refs = (x, x_skip, M0, b0, M1, b1, ..., out, halo_slab_scratch)
    x_ref = refs[0]
    skip_ref = refs[1]
    param_refs = refs[2:2 + 2 * res_num]
    out_ref = refs[2 + 2 * res_num]
    hp_ref = refs[3 + 2 * res_num]                 # [B_blk*P + g, wmax], op_dtype

    wmax = hp_ref.shape[1]
    m_rows = (B_blk - 1) * P + H                   # rows of the slab accumulator

    # Halo / padding rows: one aligned [g, wmax] block store per gap, every step,
    # so correctness never depends on which core ran the previous grid step.
    zgap = jnp.zeros((g, wmax), op_dtype)
    for b in range(B_blk + 1):
        hp_ref[pl.ds(b * P, g), :] = zgap

    # Interior rows <- (lane-padded) input images, cast to the matmul operand dtype.
    for b in range(B_blk):
        hp_ref[pl.ds(b * P + g, H), pl.ds(0, widths[0])] = x_ref[b].astype(op_dtype)

    h = None        # f32 slab accumulator of the previous layer
    h_op = None     # same, cast to op_dtype (ky=1 operand / scratch writeback)
    for layer in range(res_num):
        m_ref = param_refs[2 * layer]              # [3, K_l, wout] banded weights (resident)
        b_ref = param_refs[2 * layer + 1]          # [1, wout] lane-tiled bias (resident)
        k_l = widths[layer]

        if layer > 0:
            # Rewrite interior rows for this layer's ky=0 / ky=2 shifted reads.
            for b in range(B_blk):
                hp_ref[pl.ds(b * P + g, H), pl.ds(0, h_op.shape[1])] = (
                    h_op[b * P:b * P + H])

        acc = b_ref[...]                           # [1, wout] f32, broadcasts below
        for ky in range(3):
            if ky == 1 and layer > 0:
                # The ky=1 operand is already in registers; skip the VMEM re-read.
                lhs = h_op if h_op.shape[1] == k_l else h_op[:, :k_l]
            else:
                lhs = hp_ref[pl.ds(g - 1 + ky, m_rows), pl.ds(0, k_l)]
            # Single f32 accumulator chain across the three ky dots.
            acc = acc + jnp.dot(lhs, m_ref[ky], preferred_element_type=jnp.float32)

        h = acc                                    # ConvStack activation is Identity.
        if layer + 1 < res_num:
            h_op = h.astype(op_dtype)

    # Epilogue (f32 VPU): output = ReLU(x_skip + residual); lane-dense [H, wout] stores.
    for b in range(B_blk):
        out_ref[b] = jnp.maximum(
            skip_ref[b].astype(jnp.float32) + h[b * P:b * P + H], 0.0)


def res_conv_stack(x, x_skip, weights, biases, *, use_bf16=True, block_batch=None):
    """Forward pass of Res_CONV_stack.

    x      : [N, H, W, Cin]   float32 (NHWC)
    x_skip : [N, H, W, Cout]  float32 (NHWC)
    weights: list of res_num HWIO arrays [3, 3, Cin_l, Cout]
    biases : list of res_num arrays [Cout]
    """
    N, H, W, Cin = x.shape
    Cout = x_skip.shape[-1]
    res_num = len(weights)
    if res_num < 1:
        raise ValueError("res_num must be >= 1")
    assert H % 8 == 0, "kernel assumes H is a multiple of 8"

    op_dtype = jnp.bfloat16 if use_bf16 else jnp.float32
    # Halo/pad rows between images: match the sublane tile of the operand dtype so
    # interior stores and accumulator slices stay tile-aligned.
    g = 16 if (use_bf16 and H % 16 == 0) else 8

    LANE = 128
    k0 = W * Cin
    k0_pad = -(-k0 // LANE) * LANE                 # lane-pad layer-0 contraction dim
    wout = W * Cout
    widths = (k0_pad,) + tuple(W * w.shape[2] for w in weights[1:])
    wmax = max(widths + (wout,))

    # Pack images into the matmul M dimension: largest divisor of N whose row count
    # fits the MXU depth (256 on v6e/v7x).  The grid then iterates over batch blocks.
    if block_batch is None:
        block_batch = 1
        for d in range(1, N + 1):
            if N % d == 0 and d * H <= 256:
                block_batch = d
    B_blk = block_batch
    assert N % B_blk == 0

    P = H + g                                      # rows per image inside the slab
    T = B_blk * P + g                              # total halo-slab rows

    # Lane-dense fused (W, C) layout — contiguous reshapes only, no transpose.
    x2 = x.reshape(N, H, k0)
    if k0_pad != k0:
        x2 = jnp.pad(x2, ((0, 0), (0, 0), (0, k0_pad - k0)))
    s2 = x_skip.reshape(N, H, wout)

    # Wrapper-side parameter preconditioning (banded matrices + lane-tiled biases).
    Ms, bts = [], []
    for l, (w, b) in enumerate(zip(weights, biases)):
        Ms.append(_build_banded_weight(w, W, widths[l], op_dtype))
        bts.append(jnp.tile(jnp.asarray(b, jnp.float32).reshape(-1), W).reshape(1, wout))

    in_specs = [
        pl.BlockSpec((B_blk, H, k0_pad), lambda n: (n, 0, 0)),   # x (B_blk images / step)
        pl.BlockSpec((B_blk, H, wout), lambda n: (n, 0, 0)),     # x_skip
    ]
    params = []
    for M, bt in zip(Ms, bts):
        in_specs.append(pl.BlockSpec(M.shape, lambda n: (0, 0, 0)))   # resident weights
        in_specs.append(pl.BlockSpec(bt.shape, lambda n: (0, 0)))     # resident bias
        params.extend([M, bt])

    out_spec = pl.BlockSpec((B_blk, H, wout), lambda n: (n, 0, 0))

    kernel = functools.partial(
        _res_conv_stack_kernel, res_num=res_num, B_blk=B_blk, H=H, P=P, g=g,
        widths=widths, wout=wout, op_dtype=op_dtype)

    out2 = pl.pallas_call(
        kernel,
        out_shape=jax.ShapeDtypeStruct((N, H, wout), jnp.float32),
        grid_spec=pltpu.PrefetchScalarGridSpec(
            num_scalar_prefetch=0,
            grid=(N // B_blk,),
            in_specs=in_specs,
            out_specs=out_spec,
            scratch_shapes=[pltpu.VMEM((T, wmax), op_dtype)],
        ),
        compiler_params=pltpu.CompilerParams(
            dimension_semantics=("parallel",),
        ),
    )(x2, s2, *params)

    return out2.reshape(N, H, W, Cout)


def _reference(x, x_skip, weights, biases):
    """Pure-JAX reference (NHWC conv_general_dilated), matches PyTorch Conv2d semantics."""
    h = x
    for w, b in zip(weights, biases):
        h = lax.conv_general_dilated(
            h, w, window_strides=(1, 1), padding=((1, 1), (1, 1)),
            dimension_numbers=("NHWC", "HWIO", "NHWC"),
        ) + b.reshape(1, 1, 1, -1)
    return jnp.maximum(x_skip + h, 0.0)


if __name__ == "__main__":
    # Small shapes consistent with the module: batch=2, channel_in=4, channel_out=8,
    # spatial 16x16, res_num=2 (two stacked 3x3 convs with bias, Identity between).
    N, H, W = 2, 16, 16
    C_IN, C_OUT = 4, 8
    RES_NUM = 2

    key = jax.random.PRNGKey(0)
    kx, ks, *kw = jax.random.split(key, 2 + 2 * RES_NUM)

    x = jax.random.normal(kx, (N, H, W, C_IN), dtype=jnp.float32)
    x_skip = jax.random.normal(ks, (N, H, W, C_OUT), dtype=jnp.float32)

    weights, biases = [], []
    cin = C_IN
    for l in range(RES_NUM):
        w = 0.1 * jax.random.normal(kw[2 * l], (3, 3, cin, C_OUT), dtype=jnp.float32)
        b = 0.1 * jax.random.normal(kw[2 * l + 1], (C_OUT,), dtype=jnp.float32)
        weights.append(w)
        biases.append(b)
        cin = C_OUT

    ref = _reference(x, x_skip, weights, biases)

    # Structural-correctness check: full-f32 matmul path, tight tolerance.
    out_f32 = jax.block_until_ready(
        res_conv_stack(x, x_skip, weights, biases, use_bf16=False))
    assert out_f32.shape == (N, H, W, C_OUT)
    assert jnp.allclose(out_f32, ref, atol=1e-4, rtol=1e-4)

    # Default fast path: bf16 MXU operands with f32 accumulation (tolerance loosened
    # for bf16 operand rounding, per the performance review).
    out = jax.block_until_ready(res_conv_stack(x, x_skip, weights, biases, use_bf16=True))
    assert out.shape == (N, H, W, C_OUT)
    assert jnp.allclose(out, ref, atol=5e-2, rtol=5e-2)

    print("KERNEL_OK")
</pallas_src>

<mosaic_0001>
module attributes {stable_mosaic.version = 11 : i64} {
  func.func @_res_conv_stack_kernel(%arg0: i32, %arg1: memref<2x16x128xf32, #tpu.memory_space<vmem>>, %arg2: memref<2x16x128xf32, #tpu.memory_space<vmem>>, %arg3: memref<3x128x128xf32, #tpu.memory_space<vmem>>, %arg4: memref<1x128xf32, #tpu.memory_space<vmem>>, %arg5: memref<3x128x128xf32, #tpu.memory_space<vmem>>, %arg6: memref<1x128xf32, #tpu.memory_space<vmem>>, %arg7: memref<2x16x128xf32, #tpu.memory_space<vmem>>, %arg8: memref<56x128xf32, #tpu.memory_space<vmem>>) attributes {dimension_semantics = [#tpu.dimension_semantics<parallel>], iteration_bounds = array<i64: 1>, scalar_prefetch = 0 : i64, scratch_operands = 1 : i64, tpu.core_type = #tpu.core_type<tc>, window_params = [{transform_indices = @transform_0, window_bounds = array<i64: 2, 16, 128>}, {transform_indices = @transform_1, window_bounds = array<i64: 2, 16, 128>}, {pipeline_mode = #tpu.pipeline_mode<synchronous>, transform_indices = @transform_2, window_bounds = array<i64: 3, 128, 128>}, {pipeline_mode = #tpu.pipeline_mode<synchronous>, transform_indices = @transform_3, window_bounds = array<i64: 1, 128>}, {pipeline_mode = #tpu.pipeline_mode<synchronous>, transform_indices = @transform_4, window_bounds = array<i64: 3, 128, 128>}, {pipeline_mode = #tpu.pipeline_mode<synchronous>, transform_indices = @transform_5, window_bounds = array<i64: 1, 128>}, {transform_indices = @transform_6, window_bounds = array<i64: 2, 16, 128>}]} {
    %cst = arith.constant 0.000000e+00 : f32
    %0 = vector.broadcast %cst : f32 to vector<8x128xf32>
    %c0 = arith.constant 0 : index
    %c0_0 = arith.constant 0 : index
    %1 = vector.load %arg8[%c0, %c0_0] : memref<56x128xf32, #tpu.memory_space<vmem>>, vector<8x128xf32>
    tpu.vector_store %arg8[%c0, %c0_0], %0 {strides = array<i32>} : memref<56x128xf32, #tpu.memory_space<vmem>>, vector<8x128xf32>,
    %c24 = arith.constant 24 : index
    %c0_1 = arith.constant 0 : index
    %2 = vector.load %arg8[%c24, %c0_1] : memref<56x128xf32, #tpu.memory_space<vmem>>, vector<8x128xf32>
    tpu.vector_store %arg8[%c24, %c0_1], %0 {strides = array<i32>} : memref<56x128xf32, #tpu.memory_space<vmem>>, vector<8x128xf32>,
    %c48 = arith.constant 48 : index
    %c0_2 = arith.constant 0 : index
    %3 = vector.load %arg8[%c48, %c0_2] : memref<56x128xf32, #tpu.memory_space<vmem>>, vector<8x128xf32>
    tpu.vector_store %arg8[%c48, %c0_2], %0 {strides = array<i32>} : memref<56x128xf32, #tpu.memory_space<vmem>>, vector<8x128xf32>,
    %c0_3 = arith.constant 0 : index
    %c0_4 = arith.constant 0 : index
    %c0_5 = arith.constant 0 : index
    %4 = vector.load %arg1[%c0_3, %c0_4, %c0_5] : memref<2x16x128xf32, #tpu.memory_space<vmem>>, vector<1x16x128xf32>
    %5 = vector.shape_cast %4 : vector<1x16x128xf32> to vector<16x128xf32>
    %c8 = arith.constant 8 : index
    %c0_6 = arith.constant 0 : index
    %6 = vector.load %arg8[%c8, %c0_6] : memref<56x128xf32, #tpu.memory_space<vmem>>, vector<16x128xf32>
    tpu.vector_store %arg8[%c8, %c0_6], %5 {strides = array<i32>} : memref<56x128xf32, #tpu.memory_space<vmem>>, vector<16x128xf32>,
    %c1 = arith.constant 1 : index
    %c0_7 = arith.constant 0 : index
    %c0_8 = arith.constant 0 : index
    %7 = vector.load %arg1[%c1, %c0_7, %c0_8] : memref<2x16x128xf32, #tpu.memory_space<vmem>>, vector<1x16x128xf32>
    %8 = vector.shape_cast %7 : vector<1x16x128xf32> to vector<16x128xf32>
    %c32 = arith.constant 32 : index
    %c0_9 = arith.constant 0 : index
    %9 = vector.load %arg8[%c32, %c0_9] : memref<56x128xf32, #tpu.memory_space<vmem>>, vector<16x128xf32>
    tpu.vector_store %arg8[%c32, %c0_9], %8 {strides = array<i32>} : memref<56x128xf32, #tpu.memory_space<vmem>>, vector<16x128xf32>,
    %c0_10 = arith.constant 0 : index
    %c0_11 = arith.constant 0 : index
    %10 = vector.load %arg4[%c0_10, %c0_11] : memref<1x128xf32, #tpu.memory_space<vmem>>, vector<1x128xf32>
    %c7 = arith.constant 7 : index
    %c0_12 = arith.constant 0 : index
    %11 = vector.load %arg8[%c7, %c0_12] : memref<56x128xf32, #tpu.memory_space<vmem>>, vector<40x128xf32>
    %c0_13 = arith.constant 0 : index
    %c0_14 = arith.constant 0 : index
    %c0_15 = arith.constant 0 : index
    %12 = vector.load %arg3[%c0_13, %c0_14, %c0_15] : memref<3x128x128xf32, #tpu.memory_space<vmem>>, vector<1x128x128xf32>
    %13 = vector.shape_cast %12 : vector<1x128x128xf32> to vector<128x128xf32>
    %cst_16 = arith.constant dense<0.000000e+00> : vector<40x128xf32>
    %14 = tpu.matmul %11, %13, %cst_16 {dimension_numbers = #tpu.dot_dimension_numbers<[1], [0], [0], [1], [0, 0, 1, 1], [], []>} : vector<40x128xf32>, vector<128x128xf32>, vector<40x128xf32> -> vector<40x128xf32>
    %15 = vector.broadcast %10 : vector<1x128xf32> to vector<40x128xf32>
    %16 = arith.addf %15, %14 : vector<40x128xf32>
    %c8_17 = arith.constant 8 : index
    %c0_18 = arith.constant 0 : index
    %17 = vector.load %arg8[%c8_17, %c0_18] : memref<56x128xf32, #tpu.memory_space<vmem>>, vector<40x128xf32>
    %c1_19 = arith.constant 1 : index
    %c0_20 = arith.constant 0 : index
    %c0_21 = arith.constant 0 : index
    %18 = vector.load %arg3[%c1_19, %c0_20, %c0_21] : memref<3x128x128xf32, #tpu.memory_space<vmem>>, vector<1x128x128xf32>
    %19 = vector.shape_cast %18 : vector<1x128x128xf32> to vector<128x128xf32>
    %cst_22 = arith.constant dense<0.000000e+00> : vector<40x128xf32>
    %20 = tpu.matmul %17, %19, %cst_22 {dimension_numbers = #tpu.dot_dimension_numbers<[1], [0], [0], [1], [0, 0, 1, 1], [], []>} : vector<40x128xf32>, vector<128x128xf32>, vector<40x128xf32> -> vector<40x128xf32>
    %21 = arith.addf %16, %20 : vector<40x128xf32>
    %c9 = arith.constant 9 : index
    %c0_23 = arith.constant 0 : index
    %22 = vector.load %arg8[%c9, %c0_23] : memref<56x128xf32, #tpu.memory_space<vmem>>, vector<40x128xf32>
    %c2 = arith.constant 2 : index
    %c0_24 = arith.constant 0 : index
    %c0_25 = arith.constant 0 : index
    %23 = vector.load %arg3[%c2, %c0_24, %c0_25] : memref<3x128x128xf32, #tpu.memory_space<vmem>>, vector<1x128x128xf32>
    %24 = vector.shape_cast %23 : vector<1x128x128xf32> to vector<128x128xf32>
    %cst_26 = arith.constant dense<0.000000e+00> : vector<40x128xf32>
    %25 = tpu.matmul %22, %24, %cst_26 {dimension_numbers = #tpu.dot_dimension_numbers<[1], [0], [0], [1], [0, 0, 1, 1], [], []>} : vector<40x128xf32>, vector<128x128xf32>, vector<40x128xf32> -> vector<40x128xf32>
    %26 = arith.addf %21, %25 : vector<40x128xf32>
    %27 = vector.extract_strided_slice %26 {offsets = [0, 0], sizes = [16, 128], strides = [1, 1]} : vector<40x128xf32> to vector<16x128xf32>
    %c8_27 = arith.constant 8 : index
    %c0_28 = arith.constant 0 : index
    %28 = vector.load %arg8[%c8_27, %c0_28] : memref<56x128xf32, #tpu.memory_space<vmem>>, vector<16x128xf32>
    tpu.vector_store %arg8[%c8_27, %c0_28], %27 {strides = array<i32>} : memref<56x128xf32, #tpu.memory_space<vmem>>, vector<16x128xf32>,
    %29 = vector.extract_strided_slice %26 {offsets = [24, 0], sizes = [16, 128], strides = [1, 1]} : vector<40x128xf32> to vector<16x128xf32>
    %c32_29 = arith.constant 32 : index
    %c0_30 = arith.constant 0 : index
    %30 = vector.load %arg8[%c32_29, %c0_30] : memref<56x128xf32, #tpu.memory_space<vmem>>, vector<16x128xf32>
    tpu.vector_store %arg8[%c32_29, %c0_30], %29 {strides = array<i32>} : memref<56x128xf32, #tpu.memory_space<vmem>>, vector<16x128xf32>,
    %c0_31 = arith.constant 0 : index
    %c0_32 = arith.constant 0 : index
    %31 = vector.load %arg6[%c0_31, %c0_32] : memref<1x128xf32, #tpu.memory_space<vmem>>, vector<1x128xf32>
    %c7_33 = arith.constant 7 : index
    %c0_34 = arith.constant 0 : index
    %32 = vector.load %arg8[%c7_33, %c0_34] : memref<56x128xf32, #tpu.memory_space<vmem>>, vector<40x128xf32>
    %c0_35 = arith.constant 0 : index
    %c0_36 = arith.constant 0 : index
    %c0_37 = arith.constant 0 : index
    %33 = vector.load %arg5[%c0_35, %c0_36, %c0_37] : memref<3x128x128xf32, #tpu.memory_space<vmem>>, vector<1x128x128xf32>
    %34 = vector.shape_cast %33 : vector<1x128x128xf32> to vector<128x128xf32>
    %cst_38 = arith.constant dense<0.000000e+00> : vector<40x128xf32>
    %35 = tpu.matmul %32, %34, %cst_38 {dimension_numbers = #tpu.dot_dimension_numbers<[1], [0], [0], [1], [0, 0, 1, 1], [], []>} : vector<40x128xf32>, vector<128x128xf32>, vector<40x128xf32> -> vector<40x128xf32>
    %36 = vector.broadcast %31 : vector<1x128xf32> to vector<40x128xf32>
    %37 = arith.addf %36, %35 : vector<40x128xf32>
    %c1_39 = arith.constant 1 : index
    %c0_40 = arith.constant 0 : index
    %c0_41 = arith.constant 0 : index
    %38 = vector.load %arg5[%c1_39, %c0_40, %c0_41] : memref<3x128x128xf32, #tpu.memory_space<vmem>>, vector<1x128x128xf32>
    %39 = vector.shape_cast %38 : vector<1x128x128xf32> to vector<128x128xf32>
    %cst_42 = arith.constant dense<0.000000e+00> : vector<40x128xf32>
    %40 = tpu.matmul %26, %39, %cst_42 {dimension_numbers = #tpu.dot_dimension_numbers<[1], [0], [0], [1], [0, 0, 1, 1], [], []>} : vector<40x128xf32>, vector<128x128xf32>, vector<40x128xf32> -> vector<40x128xf32>
    %41 = arith.addf %37, %40 : vector<40x128xf32>
    %c9_43 = arith.constant 9 : index
    %c0_44 = arith.constant 0 : index
    %42 = vector.load %arg8[%c9_43, %c0_44] : memref<56x128xf32, #tpu.memory_space<vmem>>, vector<40x128xf32>
    %c2_45 = arith.constant 2 : index
    %c0_46 = arith.constant 0 : index
    %c0_47 = arith.constant 0 : index
    %43 = vector.load %arg5[%c2_45, %c0_46, %c0_47] : memref<3x128x128xf32, #tpu.memory_space<vmem>>, vector<1x128x128xf32>
    %44 = vector.shape_cast %43 : vector<1x128x128xf32> to vector<128x128xf32>
    %cst_48 = arith.constant dense<0.000000e+00> : vector<40x128xf32>
    %45 = tpu.matmul %42, %44, %cst_48 {dimension_numbers = #tpu.dot_dimension_numbers<[1], [0], [0], [1], [0, 0, 1, 1], [], []>} : vector<40x128xf32>, vector<128x128xf32>, vector<40x128xf32> -> vector<40x128xf32>
    %46 = arith.addf %41, %45 : vector<40x128xf32>
    %c0_49 = arith.constant 0 : index
    %c0_50 = arith.constant 0 : index
    %c0_51 = arith.constant 0 : index
    %47 = vector.load %arg2[%c0_49, %c0_50, %c0_51] : memref<2x16x128xf32, #tpu.memory_space<vmem>>, vector<1x16x128xf32>
    %48 = vector.shape_cast %47 : vector<1x16x128xf32> to vector<16x128xf32>
    %49 = vector.extract_strided_slice %46 {offsets = [0, 0], sizes = [16, 128], strides = [1, 1]} : vector<40x128xf32> to vector<16x128xf32>
    %50 = arith.addf %48, %49 : vector<16x128xf32>
    %cst_52 = arith.constant 0.000000e+00 : f32
    %51 = vector.broadcast %cst_52 : f32 to vector<16x128xf32>
    %52 = arith.maximumf %50, %51 : vector<16x128xf32>
    %c0_53 = arith.constant 0 : index
    %c0_54 = arith.constant 0 : index
    %c0_55 = arith.constant 0 : index
    %53 = vector.load %arg7[%c0_53, %c0_54, %c0_55] : memref<2x16x128xf32, #tpu.memory_space<vmem>>, vector<1x16x128xf32>
    %54 = vector.shape_cast %53 : vector<1x16x128xf32> to vector<16x128xf32>
    %55 = vector.shape_cast %52 : vector<16x128xf32> to vector<1x16x128xf32>
    tpu.vector_store %arg7[%c0_53, %c0_54, %c0_55], %55 {strides = array<i32>} : memref<2x16x128xf32, #tpu.memory_space<vmem>>, vector<1x16x128xf32>,
    %c1_56 = arith.constant 1 : index
    %c0_57 = arith.constant 0 : index
    %c0_58 = arith.constant 0 : index
    %56 = vector.load %arg2[%c1_56, %c0_57, %c0_58] : memref<2x16x128xf32, #tpu.memory_space<vmem>>, vector<1x16x128xf32>
    %57 = vector.shape_cast %56 : vector<1x16x128xf32> to vector<16x128xf32>
    %58 = vector.extract_strided_slice %46 {offsets = [24, 0], sizes = [16, 128], strides = [1, 1]} : vector<40x128xf32> to vector<16x128xf32>
    %59 = arith.addf %57, %58 : vector<16x128xf32>
    %cst_59 = arith.constant 0.000000e+00 : f32
    %60 = vector.broadcast %cst_59 : f32 to vector<16x128xf32>
    %61 = arith.maximumf %59, %60 : vector<16x128xf32>
    %c1_60 = arith.constant 1 : index
    %c0_61 = arith.constant 0 : index
    %c0_62 = arith.constant 0 : index
    %62 = vector.load %arg7[%c1_60, %c0_61, %c0_62] : memref<2x16x128xf32, #tpu.memory_space<vmem>>, vector<1x16x128xf32>
    %63 = vector.shape_cast %62 : vector<1x16x128xf32> to vector<16x128xf32>
    %64 = vector.shape_cast %61 : vector<16x128xf32> to vector<1x16x128xf32>
    tpu.vector_store %arg7[%c1_60, %c0_61, %c0_62], %64 {strides = array<i32>} : memref<2x16x128xf32, #tpu.memory_space<vmem>>, vector<1x16x128xf32>,
    return
  }
  func.func @transform_0(%arg0: i32) -> (i32, i32, i32) {
    %c0_i32 = arith.constant 0 : i32
    %c0_i32_0 = arith.constant 0 : i32
    %c0_i32_1 = arith.constant 0 : i32
    return %arg0, %c0_i32, %c0_i32_0 : i32, i32, i32
  }
  func.func @transform_1(%arg0: i32) -> (i32, i32, i32) {
    %c0_i32 = arith.constant 0 : i32
    %c0_i32_0 = arith.constant 0 : i32
    %c0_i32_1 = arith.constant 0 : i32
    return %arg0, %c0_i32, %c0_i32_0 : i32, i32, i32
  }
  func.func @transform_2(%arg0: i32) -> (i32, i32, i32) {
    %c0_i32 = arith.constant 0 : i32
    %c0_i32_0 = arith.constant 0 : i32
    %c0_i32_1 = arith.constant 0 : i32
    %c0_i32_2 = arith.constant 0 : i32
    return %c0_i32, %c0_i32_0, %c0_i32_1 : i32, i32, i32
  }
  func.func @transform_3(%arg0: i32) -> (i32, i32) {
    %c0_i32 = arith.constant 0 : i32
    %c0_i32_0 = arith.constant 0 : i32
    %c0_i32_1 = arith.constant 0 : i32
    return %c0_i32, %c0_i32_0 : i32, i32
  }
  func.func @transform_4(%arg0: i32) -> (i32, i32, i32) {
    %c0_i32 = arith.constant 0 : i32
    %c0_i32_0 = arith.constant 0 : i32
    %c0_i32_1 = arith.constant 0 : i32
    %c0_i32_2 = arith.constant 0 : i32
    return %c0_i32, %c0_i32_0, %c0_i32_1 : i32, i32, i32
  }
  func.func @transform_5(%arg0: i32) -> (i32, i32) {
    %c0_i32 = arith.constant 0 : i32
    %c0_i32_0 = arith.constant 0 : i32
    %c0_i32_1 = arith.constant 0 : i32
    return %c0_i32, %c0_i32_0 : i32, i32
  }
  func.func @transform_6(%arg0: i32) -> (i32, i32, i32) {
    %c0_i32 = arith.constant 0 : i32
    %c0_i32_0 = arith.constant 0 : i32
    %c0_i32_1 = arith.constant 0 : i32
    return %arg0, %c0_i32, %c0_i32_0 : i32, i32, i32
  }
}

</mosaic_0001>

<bundles_post_ra>
// kernel: tpu_custom_call.1
= control target key start
LH: loop header
LB: loop body
LE: loop exit
PB: predicated region body
PF: predicated region fallthrough
CT: control target
= control target key end

     0   :  { %11 = vsyncpa [#allocation4], 0  ;;  %s772_s0 = inlined_call_operand.hbm [shape: f32[2,16,128], index: 0, kind: input, shape index: {}]   ;;  %s773_s1 = inlined_call_operand.hbm [shape: f32[2,16,128], index: 1, kind: input, shape index: {}]   ;;  %s774_s2 = inlined_call_operand.hbm [shape: f32[3,128,128], index: 2, kind: input, shape index: {}]   ;;  %s775_s3 = inlined_call_operand.vmem [shape: f32[1,128], index: 3, kind: input, shape index: {}]   ;;  %s776_s4 = inlined_call_operand.hbm [shape: f32[3,128,128], index: 4, kind: input, shape index: {}]   ;;  %s777_s5 = inlined_call_operand.vmem [shape: f32[1,128], index: 5, kind: input, shape index: {}]   ;;  %s778_s6 = inlined_call_operand.hbm [shape: f32[2,16,128], index: 6, kind: output, shape index: {}]  }
   0x1   :  { %12 = vsyncpa [#allocation7], 0 }
   0x2   :  { %13 = vsyncpa [#allocation10], 0 }
   0x3   :  { %14 = vsyncpa [#allocation5], 0  ;;  %s32_s23 = sshll.u32 %s773_s1, 4  ;;  %s661_s24 = smov [#allocation6]   ;;  %s33_s23 = int_to_ptr.hbm [resolvable:$true] %s32_s23 }
   0x4   :  { %s34_s25 = sshll.u32 %s661_s24, 4  ;;  %s19_s28 = sshll.u32 %s772_s0, 4  ;;  %s35_s25 = int_to_ptr.vmem [resolvable:$true] %s34_s25  ;;  %s20_s28 = int_to_ptr.hbm [resolvable:$true] %s19_s28 }
   0x5   :  { %s662_s29 = smov 128   ;;  %s663_s30 = smov 8  }
   0x6   :  { %40 = dma.hbm_to_vmem [thread:$0]  %s33_s23, 512, %s35_s25, [#allocation7], %s662_s29, %s662_s29, %s663_s30  }
   0x7   :  { %s664_s7 = smov [#allocation3]   ;;  %s45_s1 = sshll.u32 %s774_s2, 4  ;;  %s46_s1 = int_to_ptr.hbm [resolvable:$true] %s45_s1 }
   0x8   :  { %s21_s8 = sshll.u32 %s664_s7, 4  ;;  %s60_s12 = sshll.u32 %s776_s4, 4  ;;  %s22_s8 = int_to_ptr.vmem [resolvable:$true] %s21_s8  ;;  %s61_s12 = int_to_ptr.hbm [resolvable:$true] %s60_s12 }
   0x9   :  { %27 = dma.hbm_to_vmem [thread:$0]  %s20_s28, 512, %s22_s8, [#allocation4], %s662_s29, %s662_s29, %s663_s30  }
   0xa   :  { %s665_s13 = smov [#allocation8]   ;;  %s666_s15 = smov [#allocation9]  }
   0xb   :  { %s47_s14 = sshll.u32 %s665_s13, 4  ;;  %s62_s2 = sshll.u32 %s666_s15, 4  ;;  %s48_s14 = int_to_ptr.vmem [resolvable:$true] %s47_s14  ;;  %s63_s2 = int_to_ptr.vmem [resolvable:$true] %s62_s2 }
   0xc   :  { %53 = dma.hbm_to_vmem [thread:$0]  %s46_s1, 6144, %s48_s14, [#allocation7], %s662_s29, %s662_s29, %s663_s30  }
   0xd   :  { %68 = dma.hbm_to_vmem [thread:$0]  %s61_s12, 6144, %s63_s2, [#allocation10], %s662_s29, %s662_s29, %s663_s30  }
   0xe   :  { %653 = dma.done.wait [#allocation4], 512  }
   0xf   :  { %654 = vsyncadd [#allocation4], 4294966784 }
  0x10   :  { %655 = dma.done.wait [#allocation7], 6656  }
  0x11   :  { %656 = vsyncadd [#allocation7], 4294960640 }
  0x12   :  { %657 = dma.done.wait [#allocation10], 6144  }
  0x13   :  { %658 = vsyncadd [#allocation10], 4294961152  ;;  %v667_v0 = vmov 0.0   ;;  %v241_v1 = vld [vmem:[#allocation8 + $0x178] sm:$0xff]  ;;  %v240_v3 = vld [vmem:[#allocation8 + $0x170] sm:$0xff]  ;;  %s476_s21 = sshll.u32 %s778_s6, 4  ;;  %s477_s21 = int_to_ptr.hbm [resolvable:$true] %s476_s21 }
  0x14   :  { %87 = vst [vmem:[#allocation2] sm:$0xff] %v667_v0  ;;  %v120_v2 = vld [vmem:[#allocation8 + $0x78] sm:$0xff]  ;;  %242 = vmatpush.msra.mxu2 %v241_v1  ;;  %v119_v4 = vld [vmem:[#allocation8 + $0x70] sm:$0xff]  ;;  %v239_v6 = vld [vmem:[#allocation8 + $0x168] sm:$0xff] }
  0x15   :  { %88 = vst [vmem:[#allocation2 + $0x18] sm:$0xff] %v667_v0  ;;  %121 = vmatpush.msra.mxu0 %v120_v2  ;;  %v182_v5 = vld [vmem:[#allocation8 + $0xf8] sm:$0xff]  ;;  %v118_v7 = vld [vmem:[#allocation8 + $0x68] sm:$0xff]  ;;  %v181_v8 = vld [vmem:[#allocation8 + $0xf0] sm:$0xff] }
  0x16   :  { %89 = vst [vmem:[#allocation2 + $0x30] sm:$0xff] %v667_v0  ;;  %183 = vmatpush.msra.mxu1 %v182_v5  ;;  %243 = vmatpush.msra.mxu2 %v240_v3  ;;  %v180_v9 = vld [vmem:[#allocation8 + $0xe8] sm:$0xff]  ;;  %v238_v10 = vld [vmem:[#allocation8 + $0x160] sm:$0xff]  ;;  %v237_v13 = vld [vmem:[#allocation8 + $0x158] sm:$0xff] }
  0x17   :  { %122 = vmatpush.msra.mxu0 %v119_v4  ;;  %v117_v11 = vld [vmem:[#allocation8 + $0x60] sm:$0xff]  ;;  %v116_v14 = vld [vmem:[#allocation8 + $0x58] sm:$0xff]  ;;  %v236_v16 = vld [vmem:[#allocation8 + $0x150] sm:$0xff] }
  0x18   :  { %184 = vmatpush.msra.mxu1 %v181_v8  ;;  %244 = vmatpush.msra.mxu2 %v239_v6  ;;  %v179_v12 = vld [vmem:[#allocation8 + $0xe0] sm:$0xff]  ;;  %v178_v15 = vld [vmem:[#allocation8 + $0xd8] sm:$0xff]  ;;  %v115_v17 = vld [vmem:[#allocation8 + $0x50] sm:$0xff] }
  0x19   :  { %123 = vmatpush.msra.mxu0 %v118_v7  ;;  %v177_v18 = vld [vmem:[#allocation8 + $0xd0] sm:$0xff]  ;;  %v235_v19 = vld [vmem:[#allocation8 + $0x148] sm:$0xff]  ;;  %v234_v22 = vld [vmem:[#allocation8 + $0x140] sm:$0xff] }
  0x1a   :  { %185 = vmatpush.msra.mxu1 %v180_v9  ;;  %245 = vmatpush.msra.mxu2 %v238_v10  ;;  %v114_v20 = vld [vmem:[#allocation8 + $0x48] sm:$0xff]  ;;  %v113_v23 = vld [vmem:[#allocation8 + $0x40] sm:$0xff]  ;;  %v233_v25 = vld [vmem:[#allocation8 + $0x138] sm:$0xff] }
  0x1b   :  { %124 = vmatpush.msra.mxu0 %v117_v11  ;;  %v176_v21 = vld [vmem:[#allocation8 + $0xc8] sm:$0xff]  ;;  %v175_v24 = vld [vmem:[#allocation8 + $0xc0] sm:$0xff]  ;;  %v112_v26 = vld [vmem:[#allocation8 + $0x38] sm:$0xff] }
  0x1c   :  { %186 = vmatpush.msra.mxu1 %v179_v12  ;;  %246 = vmatpush.msra.mxu2 %v237_v13  ;;  %v232_v27 = vld [vmem:[#allocation8 + $0x130] sm:$0xff]  ;;  %v174_v28 = vld [vmem:[#allocation8 + $0xb8] sm:$0xff]  ;;  %v90_v29 = vld [vmem:[#allocation3] sm:$0xff] }
  0x1d   :  { %125 = vmatpush.msra.mxu0 %v116_v14  ;;  %v731_v30 = vld [vmem:[#allocation3 + $0x8] sm:$0xff]  ;;  %v111_v31 = vld [vmem:[#allocation8 + $0x30] sm:$0xff]  ;;  %92 = vst [vmem:[#allocation2 + $0x8] sm:$0xff] %v90_v29  ;;  %v736_v34 = vld [vmem:[#allocation3 + $0x18] sm:$0xff] }
  0x1e   :  { %187 = vmatpush.msra.mxu1 %v178_v15  ;;  %247 = vmatpush.msra.mxu2 %v236_v16  ;;  %v173_v32 = vld [vmem:[#allocation8 + $0xb0] sm:$0xff]  ;;  %93 = vst [vmem:[#allocation2 + $0x10] sm:$0xff] %v731_v30  ;;  %v231_v35 = vld [vmem:[#allocation8 + $0x128] sm:$0xff]  ;;  %v230_v38 = vld [vmem:[#allocation8 + $0x120] sm:$0xff] }
  0x1f   :  { %126 = vmatpush.msra.mxu0 %v115_v17  ;;  %v733_v33 = vld [vmem:[#allocation3 + $0x10] sm:$0xff]  ;;  %v110_v36 = vld [vmem:[#allocation8 + $0x28] sm:$0xff]  ;;  %98 = vst [vmem:[#allocation2 + $0x28] sm:$0xff] %v736_v34  ;;  %v109_v39 = vld [vmem:[#allocation8 + $0x20] sm:$0xff] }
  0x20   :  { %188 = vmatpush.msra.mxu1 %v177_v18  ;;  %248 = vmatpush.msra.mxu2 %v235_v19  ;;  %97 = vst [vmem:[#allocation2 + $0x20] sm:$0xff] %v733_v33  ;;  %v172_v37 = vld [vmem:[#allocation8 + $0xa8] sm:$0xff]  ;;  %v171_v40 = vld [vmem:[#allocation8 + $0xa0] sm:$0xff]  ;;  %v229_v41 = vld [vmem:[#allocation8 + $0x118] sm:$0xff] }
  0x21   :  { %127 = vmatpush.msra.mxu0 %v114_v20  ;;  %v108_v42 = vld [vmem:[#allocation8 + $0x18] sm:$0xff]  ;;  %v228_v44 = vld [vmem:[#allocation8 + $0x110] sm:$0xff]  ;;  %v227_v47 = vld [vmem:[#allocation8 + $0x108] sm:$0xff] }
  0x22   :  { %189 = vmatpush.msra.mxu1 %v176_v21  ;;  %249 = vmatpush.msra.mxu2 %v234_v22  ;;  %v170_v43 = vld [vmem:[#allocation8 + $0x98] sm:$0xff]  ;;  %v107_v45 = vld [vmem:[#allocation8 + $0x10] sm:$0xff]  ;;  %v106_v48 = vld [vmem:[#allocation8 + $0x8] sm:$0xff] }
  0x23   :  { %128 = vmatpush.msra.mxu0 %v113_v23  ;;  %v169_v46 = vld [vmem:[#allocation8 + $0x90] sm:$0xff]  ;;  %v168_v49 = vld [vmem:[#allocation8 + $0x88] sm:$0xff]  ;;  %v226_v50 = vld [vmem:[#allocation8 + $0x100] sm:$0xff] }
  0x24   :  { %190 = vmatpush.msra.mxu1 %v175_v24  ;;  %250 = vmatpush.msra.mxu2 %v233_v25  ;;  %v105_v51 = vld [vmem:[#allocation8] sm:$0xff]  ;;  %v100_v53 = vld [vmem:[#allocation2 + $0x7] sm:$0xff]  ;;  %v359_v55 = vld [vmem:[#allocation9 + $0xf8] sm:$0xff] }
  0x25   :  { %129 = vmatpush.msra.mxu0 %v112_v26  ;;  %v220_v52 = vld [vmem:[#allocation2 + $0x9] sm:$0xff]  ;;  %v167_v54 = vld [vmem:[#allocation8 + $0x80] sm:$0xff]  ;;  %v357_v58 = vld [vmem:[#allocation9 + $0xe8] sm:$0xff] }
  0x26   :  { %191 = vmatpush.msra.mxu1 %v174_v28  ;;  %251 = vmatpush.msra.mxu2 %v232_v27  ;;  %v358_v56 = vld [vmem:[#allocation9 + $0xf0] sm:$0xff]  ;;  %v304_v57 = vld [vmem:[#allocation9 + $0x78] sm:$0xff]  ;;  %v356_v62 = vld [vmem:[#allocation9 + $0xe0] sm:$0xff] }
  0x27   :  { %130 = vmatpush.msra.mxu0 %v111_v31  ;;  %305 = vmatpush.msra.mxu3 %v304_v57  ;;  %v303_v59 = vld [vmem:[#allocation9 + $0x70] sm:$0xff]  ;;  %v221_v60 = vld [vmem:[#allocation2 + $0x11] sm:$0xff]  ;;  %v302_v63 = vld [vmem:[#allocation9 + $0x68] sm:$0xff] }
  0x28   :  { %192 = vmatpush.msra.mxu1 %v173_v32  ;;  %252 = vmatpush.msra.mxu2 %v231_v35  ;;  %v101_v61 = vld [vmem:[#allocation2 + $0xf] sm:$0xff]  ;;  %v301_v3 = vld [vmem:[#allocation9 + $0x60] sm:$0xff]  ;;  %v746_v7 = vld [vmem:[#allocation9 + $0x168] sm:$0xff] }
  0x29   :  { %131 = vmatpush.msra.mxu0 %v110_v36  ;;  %306 = vmatpush.msra.mxu3 %v303_v59  ;;  %v740_v1 = vld [vmem:[#allocation9 + $0x178] sm:$0xff]  ;;  %v743_v4 = vld [vmem:[#allocation9 + $0x170] sm:$0xff]  ;;  %v353_v8 = vld [vmem:[#allocation9 + $0xc8] sm:$0xff] }
  0x2a   :  { %193 = vmatpush.msra.mxu1 %v172_v37  ;;  %253 = vmatpush.msra.mxu2 %v230_v38  ;;  %v355_v2 = vld [vmem:[#allocation9 + $0xd8] sm:$0xff]  ;;  %v354_v5 = vld [vmem:[#allocation9 + $0xd0] sm:$0xff]  ;;  %v222_v10 = vld [vmem:[#allocation2 + $0x19] sm:$0xff] }
  0x2b   :  { %132 = vmatpush.msra.mxu0 %v109_v39  ;;  %307 = vmatpush.msra.mxu3 %v302_v63  ;;  %v300_v6 = vld [vmem:[#allocation9 + $0x58] sm:$0xff]  ;;  %v299_v9 = vld [vmem:[#allocation9 + $0x50] sm:$0xff]  ;;  %v352_v12 = vld [vmem:[#allocation9 + $0xc0] sm:$0xff] }
  0x2c   :  { %194 = vmatpush.msra.mxu1 %v171_v40  ;;  %254 = vmatpush.msra.mxu2 %v229_v41  ;;  %v102_v11 = vld [vmem:[#allocation2 + $0x17] sm:$0xff]  ;;  %v298_v13 = vld [vmem:[#allocation9 + $0x48] sm:$0xff]  ;;  %v350_v17 = vld [vmem:[#allocation9 + $0xb0] sm:$0xff] }
  0x2d   :  { %133 = vmatpush.msra.mxu0 %v108_v42  ;;  %308 = vmatpush.msra.mxu3 %v301_v3  ;;  %v351_v14 = vld [vmem:[#allocation9 + $0xb8] sm:$0xff]  ;;  %v297_v15 = vld [vmem:[#allocation9 + $0x40] sm:$0xff]  ;;  %v349_v18 = vld [vmem:[#allocation9 + $0xa8] sm:$0xff] }
  0x2e   :  { %195 = vmatpush.msra.mxu1 %v170_v43  ;;  %255 = vmatpush.msra.mxu2 %v228_v44  ;;  %v750_v16 = vld [vmem:[#allocation9 + $0x160] sm:$0xff]  ;;  %v223_v19 = vld [vmem:[#allocation2 + $0x21] sm:$0xff]  ;;  %v296_v23 = vld [vmem:[#allocation9 + $0x38] sm:$0xff] }
  0x2f   :  { %134 = vmatpush.msra.mxu0 %v107_v45  ;;  %309 = vmatpush.msra.mxu3 %v300_v6  ;;  %v103_v20 = vld [vmem:[#allocation2 + $0x1f] sm:$0xff]  ;;  %v104_v22 = vld [vmem:[#allocation2 + $0x27] sm:$0xff]  ;;  %v347_v24 = vld [vmem:[#allocation9 + $0x98] sm:$0xff] }
  0x30   :  { %196 = vmatpush.msra.mxu1 %v169_v46  ;;  %256 = vmatpush.msra.mxu2 %v227_v47  ;;  %v348_v21 = vld [vmem:[#allocation9 + $0xa0] sm:$0xff]  ;;  %v412_v25 = vld [vmem:[#allocation9 + $0x158] sm:$0xff]  ;;  %v295_v26 = vld [vmem:[#allocation9 + $0x30] sm:$0xff] }
  0x31   :  { %135 = vmatpush.msra.mxu0 %v106_v48  ;;  %310 = vmatpush.msra.mxu3 %v299_v9  ;;  %v346_v27 = vld [vmem:[#allocation9 + $0x90] sm:$0xff]  ;;  %v410_v31 = vld [vmem:[#allocation9 + $0x148] sm:$0xff]  ;;  %v293_v32 = vld [vmem:[#allocation9 + $0x20] sm:$0xff] }
  0x32   :  { %197 = vmatpush.msra.mxu1 %v168_v49  ;;  %257 = vmatpush.msra.mxu2 %v226_v50  ;;  %v411_v28 = vld [vmem:[#allocation9 + $0x150] sm:$0xff]  ;;  %v292_v35 = vld [vmem:[#allocation9 + $0x18] sm:$0xff]  ;;  %v290_v39 = vld [vmem:[#allocation9 + $0x8] sm:$0xff] }
  0x33   :  { %136 = vmatpush.msra.mxu0 %v105_v51  ;;  %258 = vmatmul.f32.vlgmr.msra.gmra.mxu2 %v220_v52  ;;  %v408_v36 = vld [vmem:[#allocation9 + $0x138] sm:$0xff]  ;;  %v291_v37 = vld [vmem:[#allocation9 + $0x10] sm:$0xff]  ;;  %v406_v40 = vld [vmem:[#allocation9 + $0x128] sm:$0xff] }
  0x34   :  { %137 = vmatmul.f32.vlgmr.msra.gmra.mxu0 %v100_v53  ;;  %198 = vmatpush.msra.mxu1 %v167_v54  ;;  %v407_v38 = vld [vmem:[#allocation9 + $0x130] sm:$0xff]  ;;  %v289_v41 = vld [vmem:[#allocation9] sm:$0xff]  ;;  %v404_v43 = vld [vmem:[#allocation9 + $0x118] sm:$0xff] }
  0x35   :  { %199 = vmatmul.f32.vlgmr.msra.gmra.mxu1 %v90_v29  ;;  %360 = vmatpush.msrb.mxu0 %v359_v55  ;;  %v294_v29 = vld [vmem:[#allocation9 + $0x28] sm:$0xff]  ;;  %v405_v42 = vld [vmem:[#allocation9 + $0x120] sm:$0xff]  ;;  %v403_v44 = vld [vmem:[#allocation9 + $0x110] sm:$0xff] }
  0x36   :  { %491 = vmatpush.msrb.mxu2 %v359_v55  ;;  %417 = vmatpush.msrb.mxu1 %v740_v1  ;;  %v402_v45 = vld [vmem:[#allocation9 + $0x108] sm:$0xff]  ;;  %v401_v46 = vld [vmem:[#allocation9 + $0x100] sm:$0xff] }
  0x37   :  { %361 = vmatpush.msrb.mxu0 %v358_v56  ;;  %311 = vmatpush.msra.mxu3 %v298_v13  ;;  %v531_v47 = vld [vmem:[%s775_s3] ss:$0 sm:$0xff] }
  0x38   :  { %492 = vmatpush.msrb.mxu2 %v358_v56  ;;  %418 = vmatpush.msrb.mxu1 %v743_v4 }
  0x39   :  { %362 = vmatpush.msrb.mxu0 %v357_v58  ;;  %312 = vmatpush.msra.mxu3 %v297_v15 }
  0x3a   :  { %493 = vmatpush.msrb.mxu2 %v357_v58  ;;  %419 = vmatpush.msrb.mxu1 %v746_v7 }
  0x3b   :  { %261 = vmatmul.f32.gmra.mxu2 %v221_v60  ;;  %363 = vmatpush.msrb.mxu0 %v356_v62 }
  0x3c   :  { %140 = vmatmul.f32.gmra.mxu0 %v101_v61  ;;  %494 = vmatpush.msrb.mxu2 %v356_v62 }
  0x3d   :  { %202 = vmatmul.f32.gmra.mxu1 %v731_v30  ;;  %364 = vmatpush.msrb.mxu0 %v355_v2  ;;  %v345_v30 = vld [vmem:[#allocation9 + $0x88] sm:$0xff] }
  0x3e   :  { %495 = vmatpush.msrb.mxu2 %v355_v2  ;;  %420 = vmatpush.msrb.mxu1 %v750_v16 }
  0x3f   :  { %365 = vmatpush.msrb.mxu0 %v354_v5  ;;  %313 = vmatpush.msra.mxu3 %v296_v23 }
  0x40   :  { %496 = vmatpush.msrb.mxu2 %v354_v5  ;;  %421 = vmatpush.msrb.mxu1 %v412_v25 }
  0x41   :  { %366 = vmatpush.msrb.mxu0 %v353_v8  ;;  %314 = vmatpush.msra.mxu3 %v295_v26  ;;  %v532_v26 = vld [vmem:[%s777_s5] ss:$0 sm:$0xff]  ;;  %s668_s5 = smov [#allocation11]  }
  0x42   :  { %497 = vmatpush.msrb.mxu2 %v353_v8  ;;  %422 = vmatpush.msrb.mxu1 %v411_v28  ;;  %s474_s18 = sshll.u32 %s668_s5, 4  ;;  %s475_s18 = int_to_ptr.vmem [resolvable:$true] %s474_s18 }
  0x43   :  { %264 = vmatmul.f32.gmra.mxu2 %v222_v10  ;;  %367 = vmatpush.msrb.mxu0 %v352_v12 }
  0x44   :  { %143 = vmatmul.f32.gmra.mxu0 %v102_v11  ;;  %498 = vmatpush.msrb.mxu2 %v352_v12 }
  0x45   :  { %205 = vmatmul.f32.gmra.mxu1 %v667_v0  ;;  %368 = vmatpush.msrb.mxu0 %v351_v14  ;;  %v224_v0 = vld [vmem:[#allocation2 + $0x29] sm:$0xff] }
  0x46   :  { %499 = vmatpush.msrb.mxu2 %v351_v14  ;;  %315 = vmatpush.msra.mxu3 %v294_v29 }
  0x47   :  { %369 = vmatpush.msrb.mxu0 %v350_v17  ;;  %423 = vmatpush.msrb.mxu1 %v410_v31 }
  0x48   :  { %500 = vmatpush.msrb.mxu2 %v350_v17  ;;  %316 = vmatpush.msra.mxu3 %v293_v32  ;;  %v452_v32 = vld [vmem:[#allocation6] sm:$0xff] }
  0x49   :  { %370 = vmatpush.msrb.mxu0 %v349_v18 }
  0x4a   :  { %501 = vmatpush.msrb.mxu2 %v349_v18  ;;  %317 = vmatpush.msra.mxu3 %v292_v35 }
  0x4b   :  { %267 = vmatmul.f32.gmra.mxu2 %v223_v19  ;;  %371 = vmatpush.msrb.mxu0 %v348_v21 }
  0x4c   :  { %146 = vmatmul.f32.gmra.mxu0 %v103_v20  ;;  %502 = vmatpush.msrb.mxu2 %v348_v21 }
  0x4d   :  { %208 = vmatmul.f32.gmra.mxu1 %v733_v33  ;;  %372 = vmatpush.msrb.mxu0 %v347_v24  ;;  %v344_v33 = vld [vmem:[#allocation9 + $0x80] sm:$0xff] }
  0x4e   :  { %503 = vmatpush.msrb.mxu2 %v347_v24  ;;  %318 = vmatpush.msra.mxu3 %v291_v37 }
  0x4f   :  { %373 = vmatpush.msrb.mxu0 %v346_v27 }
  0x50   :  { %504 = vmatpush.msrb.mxu2 %v346_v27  ;;  %319 = vmatpush.msra.mxu3 %v290_v39 }
  0x51   :  { %374 = vmatpush.msrb.mxu0 %v345_v30 }
  0x52   :  { %505 = vmatpush.msrb.mxu2 %v345_v30  ;;  %320 = vmatpush.msra.mxu3 %v289_v41 }
  0x53   :  { %270 = vmatmul.f32.gmra.mxu2 %v224_v0  ;;  %375 = vmatpush.msrb.mxu0 %v344_v33 }
  0x54   :  { %149 = vmatmul.f32.gmra.mxu0 %v104_v22  ;;  %506 = vmatpush.msrb.mxu2 %v344_v33 }
  0x55   :  { %211 = vmatmul.f32.gmra.mxu1 %v736_v34  ;;  %v409_v34 = vld [vmem:[#allocation9 + $0x140] sm:$0xff]  ;;  %507 = vmatpush.msrb.mxu3 %v740_v1 }
  0x56   :  { %424 = vmatpush.msrb.mxu1 %v409_v34 }
  0x57   :  { %508 = vmatpush.msrb.mxu3 %v743_v4 }
  0x58   :  { %425 = vmatpush.msrb.mxu1 %v408_v36 }
  0x59   :  { %509 = vmatpush.msrb.mxu3 %v746_v7 }
  0x5a   :  { %426 = vmatpush.msrb.mxu1 %v407_v38 }
  0x5b   :  { %510 = vmatpush.msrb.mxu3 %v750_v16 }
  0x5c   :  { %427 = vmatpush.msrb.mxu1 %v406_v40 }
  0x5d   :  { %511 = vmatpush.msrb.mxu3 %v412_v25 }
  0x5e   :  { %428 = vmatpush.msrb.mxu1 %v405_v42 }
  0x5f   :  { %512 = vmatpush.msrb.mxu3 %v411_v28 }
  0x60   :  { %429 = vmatpush.msrb.mxu1 %v404_v43 }
  0x61   :  { %513 = vmatpush.msrb.mxu3 %v410_v31 }
  0x62   :  { %430 = vmatpush.msrb.mxu1 %v403_v44 }
  0x63   :  { %514 = vmatpush.msrb.mxu3 %v409_v34 }
  0x64   :  { %431 = vmatpush.msrb.mxu1 %v402_v45 }
  0x65   :  { %515 = vmatpush.msrb.mxu3 %v408_v36 }
  0x66   :  { %432 = vmatpush.msrb.mxu1 %v401_v46 }
  0x67   :  { %516 = vmatpush.msrb.mxu3 %v407_v38 }
  0x69   :  { %517 = vmatpush.msrb.mxu3 %v406_v40  ;;  %v453_v40 = vld [vmem:[#allocation6 + $0x8] sm:$0xff] }
  0x6b   :  { %518 = vmatpush.msrb.mxu3 %v405_v42 }
  0x6d   :  { %519 = vmatpush.msrb.mxu3 %v404_v43 }
  0x6f   :  { %520 = vmatpush.msrb.mxu3 %v403_v44 }
  0x71   :  { %521 = vmatpush.msrb.mxu3 %v402_v45 }
  0x73   :  { %522 = vmatpush.msrb.mxu3 %v401_v46 }
  0xb1   :  { %v138_v48 = vpop.f32.mrf.mxu0 }
  0xb2   :  { %v156_v49 = vadd.f32 %v531_v47, %v138_v48  ;;  %v200_v50 = vpop.f32.mrf.mxu1 }
  0xb4   :  { %v215_v51 = vadd.f32 %v200_v50, %v156_v49 }
  0xb6   :  { %v259_v52 = vpop.f32.mrf.mxu2 }
  0xb7   :  { %v274_v53 = vadd.f32 %v259_v52, %v215_v51  ;;  %v461_v52 = vld [vmem:[#allocation6 + $0x10] sm:$0xff] }
  0xb9   :  { %v141_v54 = vpop.f32.mrf.mxu0  ;;  %279 = vst [vmem:[#allocation2 + $0x8] sm:$0xff] %v274_v53  ;;  %376 = vmatmul.f32.vlgmr.msrb.gmra.mxu0 %v274_v53 }
  0xba   :  { %v157_v55 = vadd.f32 %v531_v47, %v141_v54  ;;  %v203_v56 = vpop.f32.mrf.mxu1 }
  0xbc   :  { %v216_v57 = vadd.f32 %v203_v56, %v157_v55 }
  0xbe   :  { %v262_v58 = vpop.f32.mrf.mxu2 }
  0xbf   :  { %v275_v59 = vadd.f32 %v262_v58, %v216_v57 }
  0xc0   :  { %v284_v60 = vld [vmem:[#allocation2 + $0x7] sm:$0xff] }
  0xc1   :  { %v144_v61 = vpop.f32.mrf.mxu0  ;;  %280 = vst [vmem:[#allocation2 + $0x10] sm:$0xff] %v275_v59  ;;  %321 = vmatmul.f32.vlgmr.msra.gmra.mxu3 %v284_v60  ;;  %379 = vmatmul.f32.gmra.mxu0 %v275_v59  ;;  %v462_v60 = vld [vmem:[#allocation6 + $0x18] sm:$0xff] }
  0xc2   :  { %v158_v62 = vadd.f32 %v531_v47, %v144_v61  ;;  %v206_v63 = vpop.f32.mrf.mxu1 }
  0xc4   :  { %v217_v1 = vadd.f32 %v206_v63, %v158_v62 }
  0xc6   :  { %v265_v2 = vpop.f32.mrf.mxu2 }
  0xc7   :  { %v276_v3 = vadd.f32 %v265_v2, %v217_v1 }
  0xc8   :  { %v285_v4 = vld [vmem:[#allocation2 + $0xf] sm:$0xff]  ;;  %v286_v12 = vld [vmem:[#allocation2 + $0x17] sm:$0xff] }
  0xc9   :  { %v395_v5 = vld [vmem:[#allocation2 + $0x9] sm:$0xff]  ;;  %v147_v6 = vpop.f32.mrf.mxu0  ;;  %324 = vmatmul.f32.gmra.mxu3 %v285_v4  ;;  %382 = vmatmul.f32.gmra.mxu0 %v276_v3  ;;  %v396_v14 = vld [vmem:[#allocation2 + $0x11] sm:$0xff] }
  0xca   :  { %v159_v7 = vadd.f32 %v531_v47, %v147_v6  ;;  %433 = vmatmul.f32.vlgmr.msrb.gmra.mxu1 %v395_v5  ;;  %v209_v8 = vpop.f32.mrf.mxu1 }
  0xcc   :  { %v218_v9 = vadd.f32 %v209_v8, %v159_v7 }
  0xce   :  { %v268_v10 = vpop.f32.mrf.mxu2 }
  0xcf   :  { %v277_v11 = vadd.f32 %v268_v10, %v218_v9 }
  0xd1   :  { %v150_v13 = vpop.f32.mrf.mxu0  ;;  %281 = vst [vmem:[#allocation2 + $0x20] sm:$0xff] %v277_v11  ;;  %327 = vmatmul.f32.gmra.mxu3 %v286_v12  ;;  %384 = vmatmul.f32.vlgmr.msrb.gmra.mxu2 %v277_v11 }
  0xd2   :  { %v160_v15 = vadd.f32 %v531_v47, %v150_v13  ;;  %436 = vmatmul.f32.gmra.mxu1 %v396_v14  ;;  %v212_v16 = vpop.f32.mrf.mxu1 }
  0xd4   :  { %v219_v17 = vadd.f32 %v212_v16, %v160_v15 }
  0xd6   :  { %v271_v18 = vpop.f32.mrf.mxu2 }
  0xd7   :  { %v278_v19 = vadd.f32 %v271_v18, %v219_v17 }
  0xd8   :  { %v287_v20 = vld [vmem:[#allocation2 + $0x1f] sm:$0xff] }
  0xd9   :  { %v397_v21 = vld [vmem:[#allocation2 + $0x19] sm:$0xff]  ;;  %282 = vst [vmem:[#allocation2 + $0x28] sm:$0xff] %v278_v19  ;;  %329 = vmatmul.f32.gmra.mxu3 %v287_v20  ;;  %387 = vmatmul.f32.gmra.mxu2 %v278_v19 }
  0xda   :  { %439 = vmatmul.f32.gmra.mxu1 %v397_v21 }
  0xe0   :  { %v288_v0 = vld [vmem:[#allocation2 + $0x27] sm:$0xff] }
  0xe1   :  { %332 = vmatmul.f32.gmra.mxu3 %v288_v0  ;;  %v398_v22 = vld [vmem:[#allocation2 + $0x21] sm:$0xff]  ;;  %v399_v23 = vld [vmem:[#allocation2 + $0x29] sm:$0xff] }
  0xe9   :  { %441 = vmatmul.f32.vlgmr.msrb.gmra.mxu3 %v398_v22 }
  0xf1   :  { %444 = vmatmul.f32.gmra.mxu3 %v399_v23 }
 0x136   :  { %v377_v24 = vpop.f32.mrf.mxu0 }
 0x13e   :  { %v380_v25 = vpop.f32.mrf.mxu0 }
 0x144   :  { %v322_v27 = vpop.f32.mrf.mxu3 }
 0x145   :  { %v339_v28 = vadd.f32 %v532_v26, %v322_v27 }
 0x146   :  { %v383_v29 = vpop.f32.mrf.mxu0 }
 0x147   :  { %v391_v30 = vadd.f32 %v377_v24, %v339_v28  ;;  %v434_v31 = vpop.f32.mrf.mxu1 }
 0x149   :  { %v448_v33 = vadd.f32 %v434_v31, %v391_v30 }
 0x14b   :  { %v454_v34 = vadd.f32 %v452_v32, %v448_v33 }
 0x14c   :  { %v325_v35 = vpop.f32.mrf.mxu3 }
 0x14d   :  { %v456_v36 = vmax.f32 %v454_v34, 0.0  ;;  %v340_v37 = vadd.f32 %v532_v26, %v325_v35 }
 0x14f   :  { %458 = vst [vmem:[#allocation11] sm:$0xff] %v456_v36  ;;  %v392_v38 = vadd.f32 %v380_v25, %v340_v37  ;;  %v437_v39 = vpop.f32.mrf.mxu1 }
 0x151   :  { %v449_v41 = vadd.f32 %v437_v39, %v392_v38 }
 0x153   :  { %v455_v42 = vadd.f32 %v453_v40, %v449_v41 }
 0x154   :  { %v328_v43 = vpop.f32.mrf.mxu3  ;;  %v385_v49 = vpop.f32.mrf.mxu2 }
 0x155   :  { %v457_v44 = vmax.f32 %v455_v42, 0.0 }
 0x157   :  { %459 = vst [vmem:[#allocation11 + $0x8] sm:$0xff] %v457_v44  ;;  %v440_v45 = vpop.f32.mrf.mxu1 }
 0x15c   :  { %v330_v46 = vpop.f32.mrf.mxu3  ;;  %v388_v57 = vpop.f32.mrf.mxu2 }
 0x15d   :  { %v341_v48 = vadd.f32 %v532_v26, %v330_v46 }
 0x15f   :  { %v393_v50 = vadd.f32 %v385_v49, %v341_v48 }
 0x164   :  { %v333_v47 = vpop.f32.mrf.mxu3 }
 0x165   :  { %v342_v54 = vadd.f32 %v532_v26, %v333_v47 }
 0x167   :  { %v394_v58 = vadd.f32 %v388_v57, %v342_v54 }
 0x16c   :  { %v442_v51 = vpop.f32.mrf.mxu3 }
 0x16d   :  { %v450_v53 = vadd.f32 %v442_v51, %v393_v50 }
 0x16f   :  { %v463_v55 = vadd.f32 %v461_v52, %v450_v53 }
 0x171   :  { %v465_v56 = vmax.f32 %v463_v55, 0.0 }
 0x173   :  { %468 = vst [vmem:[#allocation11 + $0x10] sm:$0xff] %v465_v56 }
 0x174   :  { %v445_v59 = vpop.f32.mrf.mxu3 }
 0x175   :  { %v451_v61 = vadd.f32 %v445_v59, %v394_v58 }
 0x177   :  { %v464_v62 = vadd.f32 %v462_v60, %v451_v61 }
 0x179   :  { %v466_v63 = vmax.f32 %v464_v62, 0.0 }
 0x17b   :  { %469 = vst [vmem:[#allocation11 + $0x18] sm:$0xff] %v466_v63 }
 0x17c   :  { %482 = dma.vmem_to_hbm [thread:$0]  %s475_s18, 512, %s477_s21, [#allocation5], %s662_s29, %s662_s29, %s663_s30  }
 0x17d   :  { %659 = dma.done.wait [#allocation5], 512  }
 0x17e   :  { %660 = vsyncadd [#allocation5], 4294966784 }
 0x17f   :  { %487 = vsyncpa [#allocation4], 1 }
 0x180   :  { %488 = vsyncpa [#allocation7], 1 }
 0x181   :  { %489 = vsyncpa [#allocation10], 1 }
 0x182   :  { %490 = vsyncpa [#allocation5], 1 }

</bundles_post_ra>
